<compile_context>
chip_gen: v7x
topology: tpu7x:2x2x1
jax: 0.10.0
libtpu: 0.0.40
codegen_flags: <defaults>
</compile_context>

<pallas_src>
from functools import lru_cache, partial

import jax
import jax.numpy as jnp
from jax.experimental import pallas as pl
from jax.experimental.pallas import tpu as pltpu


# ---------------------------------------------------------------------------
# Hardware-dependent budgets
# ---------------------------------------------------------------------------

@lru_cache(maxsize=None)
def _hw_config():
    """VMEM budget / tile preferences per TPU generation.

    v5e / v6e have 128 MiB physical VMEM -> 96 MiB scoped budget and larger
    GEMM tiles; v7x (64 MiB physical) and unknown chips get the conservative
    32 MiB scoped budget.
    """
    vmem_phys = None
    try:
        info = pltpu.get_tpu_info()
        vmem_phys = getattr(info, "vmem_capacity_bytes", None)
    except Exception:
        vmem_phys = None
    if isinstance(vmem_phys, (int, float)) and vmem_phys >= 100 * 2**20:
        return dict(vmem_limit=96 * 2**20, tm=512, tn=256, tk=512,
                    tq=256, tkv=512)
    return dict(vmem_limit=32 * 2**20, tm=256, tn=256, tk=512,
                tq=256, tkv=512)


def _pick_tile(dim, preferred, step):
    """Largest tile <= preferred that divides `dim` (stepping down by `step`);
    falls back to the full dim (always legal for a BlockSpec) otherwise."""
    if dim <= preferred:
        return dim
    t = (preferred // step) * step
    while t >= step:
        if dim % t == 0:
            return t
        t -= step
    return dim


# ---------------------------------------------------------------------------
# Head packing helpers (inside kernels)
# ---------------------------------------------------------------------------

def _split_heads(block_ref, num_heads, head_dim):
    """(1, rows, C) block ref -> (H, rows, D) value.

    Built only from static lane slices + a leading-axis stack (known-good
    lowering); feeds one head-batched dot instead of H per-head dots."""
    return jnp.stack(
        [block_ref[0, :, h * head_dim:(h + 1) * head_dim]
         for h in range(num_heads)],
        axis=0)


def _merge_heads(xh):
    """(H, rows, D) value -> (rows, H*D) value so the output store is a single
    lane-dense write (no per-head masked partial stores)."""
    return jnp.concatenate([xh[h] for h in range(xh.shape[0])], axis=-1)


# ---------------------------------------------------------------------------
# Fused, tiled QKV projection (bias-free): q,k,v = (x @ Wq)*scale, x @ Wk, x @ Wv
# ---------------------------------------------------------------------------

def _qkv_proj_kernel(x_ref, wq_ref, wk_ref, wv_ref, q_ref, k_ref, v_ref,
                     acc_q, acc_k, acc_v, *, scale):
    kk = pl.program_id(2)

    @pl.when(kk == 0)
    def _init():
        acc_q[...] = jnp.zeros_like(acc_q)
        acc_k[...] = jnp.zeros_like(acc_k)
        acc_v[...] = jnp.zeros_like(acc_v)

    x = x_ref[...]
    acc_q[...] += jnp.dot(x, wq_ref[...], preferred_element_type=jnp.float32)
    acc_k[...] += jnp.dot(x, wk_ref[...], preferred_element_type=jnp.float32)
    acc_v[...] += jnp.dot(x, wv_ref[...], preferred_element_type=jnp.float32)

    @pl.when(kk == pl.num_programs(2) - 1)
    def _finalize():
        # 1/sqrt(D) folded into q once here (removes the per-kv-step score
        # multiply from the attention inner loop).
        q_ref[...] = (acc_q[...] * scale).astype(q_ref.dtype)
        k_ref[...] = acc_k[...].astype(k_ref.dtype)
        v_ref[...] = acc_v[...].astype(v_ref.dtype)


def pallas_qkv_proj(x2d, wq, wk, wv, *, scale, out_dtype):
    """x2d: [M, K]; wq/wk/wv: [K, C] -> (q*scale, k, v) each [M, C] out_dtype."""
    M, K = x2d.shape
    C = wq.shape[1]
    cfg = _hw_config()
    tm = _pick_tile(M, cfg["tm"], 8)
    tn = _pick_tile(C, cfg["tn"], 128)
    tk = _pick_tile(K, cfg["tk"], 128)
    grid = (M // tm, C // tn, K // tk)

    x_spec = pl.BlockSpec((tm, tk), lambda i, j, k: (i, k))
    w_spec = pl.BlockSpec((tk, tn), lambda i, j, k: (k, j))
    o_spec = pl.BlockSpec((tm, tn), lambda i, j, k: (i, j))
    o_shape = jax.ShapeDtypeStruct((M, C), out_dtype)

    itm_in = jnp.dtype(x2d.dtype).itemsize
    itm_out = jnp.dtype(out_dtype).itemsize
    cost = pl.CostEstimate(
        flops=2 * 3 * M * K * C,
        transcendentals=0,
        bytes_accessed=itm_in * (M * K + 3 * K * C) + itm_out * 3 * M * C)

    return pl.pallas_call(
        partial(_qkv_proj_kernel, scale=scale),
        grid=grid,
        in_specs=[x_spec, w_spec, w_spec, w_spec],
        out_specs=(o_spec, o_spec, o_spec),
        out_shape=(o_shape, o_shape, o_shape),
        scratch_shapes=[pltpu.VMEM((tm, tn), jnp.float32) for _ in range(3)],
        compiler_params=pltpu.CompilerParams(
            dimension_semantics=("parallel", "parallel", "arbitrary"),
            vmem_limit_bytes=cfg["vmem_limit"]),
        cost_estimate=cost,
    )(x2d, wq, wk, wv)


# ---------------------------------------------------------------------------
# Tiled linear with bias (output projection)
# ---------------------------------------------------------------------------

def _linear_bias_kernel(x_ref, w_ref, b_ref, o_ref, acc_ref):
    kk = pl.program_id(2)

    @pl.when(kk == 0)
    def _init():
        acc_ref[...] = jnp.zeros_like(acc_ref)

    acc_ref[...] += jnp.dot(x_ref[...], w_ref[...],
                            preferred_element_type=jnp.float32)

    @pl.when(kk == pl.num_programs(2) - 1)
    def _finalize():
        o_ref[...] = (acc_ref[...] + b_ref[...]).astype(o_ref.dtype)


def pallas_linear_bias(x2d, w, b):
    """x2d: [M, K]; w: [K, Nout]; b: [Nout] -> [M, Nout] float32."""
    M, K = x2d.shape
    Nout = w.shape[1]
    cfg = _hw_config()
    b2d = b.reshape(1, Nout).astype(jnp.float32)
    tm = _pick_tile(M, cfg["tm"], 8)
    tn = _pick_tile(Nout, cfg["tn"], 128)
    tk = _pick_tile(K, cfg["tk"], 128)
    grid = (M // tm, Nout // tn, K // tk)

    itm = jnp.dtype(x2d.dtype).itemsize
    cost = pl.CostEstimate(
        flops=2 * M * K * Nout,
        transcendentals=0,
        bytes_accessed=itm * (M * K + K * Nout) + 4 * (Nout + M * Nout))

    return pl.pallas_call(
        _linear_bias_kernel,
        grid=grid,
        in_specs=[
            pl.BlockSpec((tm, tk), lambda i, j, k: (i, k)),
            pl.BlockSpec((tk, tn), lambda i, j, k: (k, j)),
            pl.BlockSpec((1, tn), lambda i, j, k: (0, j)),
        ],
        out_specs=pl.BlockSpec((tm, tn), lambda i, j, k: (i, j)),
        out_shape=jax.ShapeDtypeStruct((M, Nout), jnp.float32),
        scratch_shapes=[pltpu.VMEM((tm, tn), jnp.float32)],
        compiler_params=pltpu.CompilerParams(
            dimension_semantics=("parallel", "parallel", "arbitrary"),
            vmem_limit_bytes=cfg["vmem_limit"]),
        cost_estimate=cost,
    )(x2d, w, b2d)


# ---------------------------------------------------------------------------
# Multi-head attention, variant 1: materialises attn probs (module semantics)
# Tiled over (B, q-tiles); all heads batched into one MXU contraction.
# ---------------------------------------------------------------------------

def _mha_probs_kernel(q_ref, k_ref, v_ref, o_ref, attn_ref, *, num_heads):
    C = q_ref.shape[2]
    D = C // num_heads
    qh = _split_heads(q_ref, num_heads, D)   # (H, tq, D) - scale already in q
    kh = _split_heads(k_ref, num_heads, D)   # (H, N, D)
    vh = _split_heads(v_ref, num_heads, D)   # (H, N, D)

    s = jnp.einsum("hqd,hkd->hqk", qh, kh, preferred_element_type=jnp.float32)
    s = s - jnp.max(s, axis=-1, keepdims=True)
    p = jnp.exp(s)
    p = p * pl.reciprocal(jnp.sum(p, axis=-1, keepdims=True), approx=False)
    attn_ref[0] = p.astype(attn_ref.dtype)                 # lane-dense (.., N)
    o = jnp.einsum("hqk,hkd->hqd", p.astype(vh.dtype), vh,
                   preferred_element_type=jnp.float32)     # (H, tq, D)
    o_ref[0] = _merge_heads(o).astype(o_ref.dtype)         # one full-C store


def _probs_q_tile(N, num_heads, vmem_limit, pref):
    """Largest q tile (multiple of 8, dividing N) whose double-buffered attn
    block fits a fraction of the scoped VMEM budget; falls back to full N."""
    budget = vmem_limit // 4
    cands = [t for t in range(8, min(N, pref) + 1, 8) if N % t == 0]
    if not cands:
        return N
    for t in reversed(cands):
        if 2 * num_heads * t * N * 4 <= budget:
            return t
    return cands[0]


def pallas_mha_probs(q, k, v, num_heads, *, out_dtype, attn_dtype=jnp.float32):
    """q,k,v: [B, N, C] (heads packed in C, scale folded into q)
       -> (o [B,N,C], attn [B,H,N,N])."""
    B, N, C = q.shape
    cfg = _hw_config()
    tq = _probs_q_tile(N, num_heads, cfg["vmem_limit"], cfg["tq"])
    grid = (B, N // tq)

    q_spec = pl.BlockSpec((1, tq, C), lambda b, i: (b, i, 0))
    kv_spec = pl.BlockSpec((1, N, C), lambda b, i: (b, 0, 0))
    o_spec = pl.BlockSpec((1, tq, C), lambda b, i: (b, i, 0))
    attn_spec = pl.BlockSpec((1, num_heads, tq, N), lambda b, i: (b, 0, i, 0))

    itm = jnp.dtype(q.dtype).itemsize
    cost = pl.CostEstimate(
        flops=4 * B * N * N * C,
        transcendentals=B * num_heads * N * N,
        bytes_accessed=(itm * 3 * B * N * C
                        + jnp.dtype(out_dtype).itemsize * B * N * C
                        + jnp.dtype(attn_dtype).itemsize * B * num_heads * N * N))

    return pl.pallas_call(
        partial(_mha_probs_kernel, num_heads=num_heads),
        grid=grid,
        in_specs=[q_spec, kv_spec, kv_spec],
        out_specs=(o_spec, attn_spec),
        out_shape=(jax.ShapeDtypeStruct((B, N, C), out_dtype),
                   jax.ShapeDtypeStruct((B, num_heads, N, N), attn_dtype)),
        compiler_params=pltpu.CompilerParams(
            dimension_semantics=("parallel", "parallel"),
            vmem_limit_bytes=cfg["vmem_limit"]),
        cost_estimate=cost,
    )(q, k, v)


# ---------------------------------------------------------------------------
# Multi-head attention, variant 2: flash-style (no NxN writeback)
# ---------------------------------------------------------------------------

def _mha_flash_kernel(q_ref, k_ref, v_ref, o_ref,
                      qh_ref, m_ref, l_ref, acc_ref, *, num_heads):
    j = pl.program_id(2)
    C = q_ref.shape[2]
    D = C // num_heads

    @pl.when(j == 0)
    def _init():
        m_ref[...] = jnp.full_like(m_ref, -jnp.inf)
        l_ref[...] = jnp.zeros_like(l_ref)
        acc_ref[...] = jnp.zeros_like(acc_ref)
        # Cache q in head-batched (H, tq, D) layout once per q tile.
        qh_ref[...] = _split_heads(q_ref, num_heads, D)

    kh = _split_heads(k_ref, num_heads, D)               # (H, tkv, D)
    vh = _split_heads(v_ref, num_heads, D)               # (H, tkv, D)

    s = jnp.einsum("hqd,hkd->hqk", qh_ref[...], kh,
                   preferred_element_type=jnp.float32)   # (H, tq, tkv)
    m_prev = m_ref[...]
    m_new = jnp.maximum(m_prev, jnp.max(s, axis=-1, keepdims=True))
    alpha = jnp.exp(m_prev - m_new)
    p = jnp.exp(s - m_new)
    l_ref[...] = alpha * l_ref[...] + jnp.sum(p, axis=-1, keepdims=True)
    m_ref[...] = m_new
    # Single full-width accumulator update (no per-head partial-lane RMW).
    acc_ref[...] = alpha * acc_ref[...] + jnp.einsum(
        "hqk,hkd->hqd", p.astype(vh.dtype), vh,
        preferred_element_type=jnp.float32)

    @pl.when(j == pl.num_programs(2) - 1)
    def _finalize():
        o = acc_ref[...] * pl.reciprocal(l_ref[...], approx=False)
        o_ref[0] = _merge_heads(o).astype(o_ref.dtype)   # one full-C store


def pallas_mha_flash(q, k, v, num_heads, *, out_dtype):
    """q,k,v: [B, N, C] (scale folded into q) -> o [B, N, C];
    never materialises the NxN probabilities."""
    B, N, C = q.shape
    D = C // num_heads
    cfg = _hw_config()
    tq = _pick_tile(N, cfg["tq"], 8)
    tkv = _pick_tile(N, cfg["tkv"], 128)   # kv tile steps by 128 (lane/MXU align)
    grid = (B, N // tq, N // tkv)

    q_spec = pl.BlockSpec((1, tq, C), lambda b, i, j: (b, i, 0))
    kv_spec = pl.BlockSpec((1, tkv, C), lambda b, i, j: (b, j, 0))
    o_spec = pl.BlockSpec((1, tq, C), lambda b, i, j: (b, i, 0))

    itm = jnp.dtype(q.dtype).itemsize
    cost = pl.CostEstimate(
        flops=4 * B * N * N * C,
        transcendentals=B * num_heads * N * N,
        bytes_accessed=(itm * 3 * B * N * C
                        + jnp.dtype(out_dtype).itemsize * B * N * C))

    return pl.pallas_call(
        partial(_mha_flash_kernel, num_heads=num_heads),
        grid=grid,
        in_specs=[q_spec, kv_spec, kv_spec],
        out_specs=o_spec,
        out_shape=jax.ShapeDtypeStruct((B, N, C), out_dtype),
        scratch_shapes=[
            pltpu.VMEM((num_heads, tq, D), q.dtype),      # cached head-split q
            pltpu.VMEM((num_heads, tq, 1), jnp.float32),  # running max
            pltpu.VMEM((num_heads, tq, 1), jnp.float32),  # running sum
            pltpu.VMEM((num_heads, tq, D), jnp.float32),  # output accumulator
        ],
        compiler_params=pltpu.CompilerParams(
            dimension_semantics=("parallel", "parallel", "arbitrary"),
            vmem_limit_bytes=cfg["vmem_limit"]),
        cost_estimate=cost,
    )(q, k, v)


# ---------------------------------------------------------------------------
# One-time parameter preparation (hoisted out of the forward)
# ---------------------------------------------------------------------------

def prepare_attention_params(params, *, mxu_dtype=None):
    """Transpose PyTorch (out, in)-layout weights and cast once, not per call."""
    C = params["w_proj"].shape[0]
    w_qkv = params["w_qkv"]
    wdt = mxu_dtype if mxu_dtype is not None else jnp.float32
    return {
        "wq": jnp.asarray(w_qkv[0:C, :].T, dtype=wdt),
        "wk": jnp.asarray(w_qkv[C:2 * C, :].T, dtype=wdt),
        "wv": jnp.asarray(w_qkv[2 * C:3 * C, :].T, dtype=wdt),
        "wp": jnp.asarray(params["w_proj"].T, dtype=wdt),
        "b_proj": jnp.asarray(params["b_proj"], dtype=jnp.float32),
    }


# ---------------------------------------------------------------------------
# Module forward
# ---------------------------------------------------------------------------

def attention_forward(x, prepared_params, num_heads, *, return_attn=True,
                      mxu_dtype=None, attn_dtype=jnp.float32):
    """Forward of easycv Attention (hydra_attention=False, rel_pos_bias=None,
    attn_drop = proj_drop = 0 -> identity dropout).

    mxu_dtype: optionally bf16 on any generation (MXU inputs only; softmax and
    all accumulation stay f32 inside the kernels). q/k/v and the attention
    output are emitted directly in that dtype by the kernels (no wrapper
    re-cast HBM round trip). None keeps full f32 for strict tolerances.
    attn_dtype controls the dtype of the returned probabilities.
    """
    # TODO(synk): hydra_attention=True branch, rel_pos_bias and dropout p>0
    # are not implemented (module defaults: False / None / 0.0 -> identity).
    B, N, C = x.shape
    head_dim = C // num_heads
    scale = head_dim ** -0.5
    inter_dtype = mxu_dtype if mxu_dtype is not None else jnp.float32

    x2d = x.reshape(B * N, C)
    if mxu_dtype is not None:
        x2d = x2d.astype(mxu_dtype)

    # Fused bias-free QKV projection; outputs stay head-packed in the channel
    # axis (no [B,N,3,H,D] permute / HBM transpose), scale folded into q.
    q2d, k2d, v2d = pallas_qkv_proj(
        x2d, prepared_params["wq"], prepared_params["wk"], prepared_params["wv"],
        scale=scale, out_dtype=inter_dtype)
    q = q2d.reshape(B, N, C)
    k = k2d.reshape(B, N, C)
    v = v2d.reshape(B, N, C)

    if return_attn:
        o, attn = pallas_mha_probs(q, k, v, num_heads,
                                   out_dtype=inter_dtype, attn_dtype=attn_dtype)
    else:
        o = pallas_mha_flash(q, k, v, num_heads, out_dtype=inter_dtype)
        attn = None

    # o is already [B, N, C] == (attn @ v).transpose(1, 2).reshape(B, N, C).
    out2d = pallas_linear_bias(o.reshape(B * N, C),
                               prepared_params["wp"], prepared_params["b_proj"])
    return out2d.reshape(B, N, C), attn


# ---------------------------------------------------------------------------
# Pure-JAX reference (for correctness check)
# ---------------------------------------------------------------------------

def attention_forward_ref(x, params, num_heads):
    B, N, C = x.shape
    D = C // num_heads
    scale = D ** -0.5
    qkv = x @ params["w_qkv"].T
    qkv = qkv.reshape(B, N, 3, num_heads, D).transpose(2, 0, 3, 1, 4)
    q, k, v = qkv[0], qkv[1], qkv[2]
    attn = jnp.einsum("bhnd,bhmd->bhnm", q, k) * scale
    attn = jax.nn.softmax(attn, axis=-1)
    o = jnp.einsum("bhnm,bhmd->bhnd", attn, v)
    xo = o.transpose(0, 2, 1, 3).reshape(B, N, C)
    xo = xo @ params["w_proj"].T + params["b_proj"]
    return xo, attn


# ---------------------------------------------------------------------------
# Main
# ---------------------------------------------------------------------------

if __name__ == "__main__":
    B, N, C, H = 2, 8, 32, 8  # batch, tokens, dim, num_heads (head_dim = 4)

    key = jax.random.PRNGKey(0)
    kx, kq, kp, kb = jax.random.split(key, 4)

    x = jax.random.normal(kx, (B, N, C), dtype=jnp.float32)
    params = {
        "w_qkv": 0.02 * jax.random.normal(kq, (3 * C, C), dtype=jnp.float32),
        "w_proj": 0.02 * jax.random.normal(kp, (C, C), dtype=jnp.float32),
        "b_proj": 0.02 * jax.random.normal(kb, (C,), dtype=jnp.float32),
    }

    # One-time parameter preparation (transposes / casts hoisted out of forward).
    prepared = prepare_attention_params(params, mxu_dtype=None)

    # Module-semantics path (returns attention probabilities, like PyTorch).
    out, attn = attention_forward(x, prepared, H, return_attn=True)
    out = jax.block_until_ready(out)
    attn = jax.block_until_ready(attn)

    # Flash-style path (attn not materialised) -- same output values.
    out_flash, _ = attention_forward(x, prepared, H, return_attn=False)
    out_flash = jax.block_until_ready(out_flash)

    ref_out, ref_attn = attention_forward_ref(x, params, H)

    assert out.shape == (B, N, C) and attn.shape == (B, H, N, N)
    assert jnp.allclose(out, ref_out, atol=1e-5, rtol=1e-5)
    assert jnp.allclose(attn, ref_attn, atol=1e-5, rtol=1e-5)
    assert jnp.allclose(out_flash, ref_out, atol=1e-5, rtol=1e-5)

    print("KERNEL_OK")
</pallas_src>

<mosaic_0001>
module attributes {stable_mosaic.version = 11 : i64} {
  func.func @_qkv_proj_kernel(%arg0: i32, %arg1: i32, %arg2: i32, %arg3: memref<16x32xf32, #tpu.memory_space<vmem>>, %arg4: memref<32x32xf32, #tpu.memory_space<vmem>>, %arg5: memref<32x32xf32, #tpu.memory_space<vmem>>, %arg6: memref<32x32xf32, #tpu.memory_space<vmem>>, %arg7: memref<16x32xf32, #tpu.memory_space<vmem>>, %arg8: memref<16x32xf32, #tpu.memory_space<vmem>>, %arg9: memref<16x32xf32, #tpu.memory_space<vmem>>, %arg10: memref<16x32xf32, #tpu.memory_space<vmem>>, %arg11: memref<16x32xf32, #tpu.memory_space<vmem>>, %arg12: memref<16x32xf32, #tpu.memory_space<vmem>>) attributes {dimension_semantics = [#tpu.dimension_semantics<parallel>, #tpu.dimension_semantics<parallel>, #tpu.dimension_semantics<arbitrary>], iteration_bounds = array<i64: 1, 1, 1>, scalar_prefetch = 0 : i64, scratch_operands = 3 : i64, tpu.core_type = #tpu.core_type<tc>, window_params = [{transform_indices = @transform_0, window_bounds = array<i64: 16, 32>}, {transform_indices = @transform_1, window_bounds = array<i64: 32, 32>}, {transform_indices = @transform_2, window_bounds = array<i64: 32, 32>}, {transform_indices = @transform_3, window_bounds = array<i64: 32, 32>}, {transform_indices = @transform_4, window_bounds = array<i64: 16, 32>}, {transform_indices = @transform_5, window_bounds = array<i64: 16, 32>}, {transform_indices = @transform_6, window_bounds = array<i64: 16, 32>}]} {
    %c0_i32 = arith.constant 0 : i32
    %0 = arith.cmpi eq, %arg2, %c0_i32 : i32
    %1 = arith.extui %0 : i1 to i32
    %c0_i32_0 = arith.constant 0 : i32
    %2 = arith.cmpi ne, %1, %c0_i32_0 : i32
    scf.if %2 {
      %cst_24 = arith.constant 0.000000e+00 : f32
      %22 = vector.broadcast %cst_24 : f32 to vector<16x32xf32>
      %c0_25 = arith.constant 0 : index
      %c0_26 = arith.constant 0 : index
      %23 = vector.load %arg10[%c0_25, %c0_26] : memref<16x32xf32, #tpu.memory_space<vmem>>, vector<16x32xf32>
      tpu.vector_store %arg10[%c0_25, %c0_26], %22 {strides = array<i32>} : memref<16x32xf32, #tpu.memory_space<vmem>>, vector<16x32xf32>,
      %cst_27 = arith.constant 0.000000e+00 : f32
      %24 = vector.broadcast %cst_27 : f32 to vector<16x32xf32>
      %c0_28 = arith.constant 0 : index
      %c0_29 = arith.constant 0 : index
      %25 = vector.load %arg11[%c0_28, %c0_29] : memref<16x32xf32, #tpu.memory_space<vmem>>, vector<16x32xf32>
      tpu.vector_store %arg11[%c0_28, %c0_29], %24 {strides = array<i32>} : memref<16x32xf32, #tpu.memory_space<vmem>>, vector<16x32xf32>,
      %cst_30 = arith.constant 0.000000e+00 : f32
      %26 = vector.broadcast %cst_30 : f32 to vector<16x32xf32>
      %c0_31 = arith.constant 0 : index
      %c0_32 = arith.constant 0 : index
      %27 = vector.load %arg12[%c0_31, %c0_32] : memref<16x32xf32, #tpu.memory_space<vmem>>, vector<16x32xf32>
      tpu.vector_store %arg12[%c0_31, %c0_32], %26 {strides = array<i32>} : memref<16x32xf32, #tpu.memory_space<vmem>>, vector<16x32xf32>,
    } else {
    }
    %c0 = arith.constant 0 : index
    %c0_1 = arith.constant 0 : index
    %3 = vector.load %arg3[%c0, %c0_1] : memref<16x32xf32, #tpu.memory_space<vmem>>, vector<16x32xf32>
    %c0_2 = arith.constant 0 : index
    %c0_3 = arith.constant 0 : index
    %4 = vector.load %arg10[%c0_2, %c0_3] : memref<16x32xf32, #tpu.memory_space<vmem>>, vector<16x32xf32>
    %c0_4 = arith.constant 0 : index
    %c0_5 = arith.constant 0 : index
    %5 = vector.load %arg4[%c0_4, %c0_5] : memref<32x32xf32, #tpu.memory_space<vmem>>, vector<32x32xf32>
    %cst = arith.constant dense<0.000000e+00> : vector<16x32xf32>
    %6 = tpu.matmul %3, %5, %cst {dimension_numbers = #tpu.dot_dimension_numbers<[1], [0], [0], [1], [0, 0, 1, 1], [], []>} : vector<16x32xf32>, vector<32x32xf32>, vector<16x32xf32> -> vector<16x32xf32>
    %7 = arith.addf %4, %6 : vector<16x32xf32>
    %c0_6 = arith.constant 0 : index
    %c0_7 = arith.constant 0 : index
    %8 = vector.load %arg10[%c0_6, %c0_7] : memref<16x32xf32, #tpu.memory_space<vmem>>, vector<16x32xf32>
    tpu.vector_store %arg10[%c0_6, %c0_7], %7 {strides = array<i32>} : memref<16x32xf32, #tpu.memory_space<vmem>>, vector<16x32xf32>,
    %c0_8 = arith.constant 0 : index
    %c0_9 = arith.constant 0 : index
    %9 = vector.load %arg11[%c0_8, %c0_9] : memref<16x32xf32, #tpu.memory_space<vmem>>, vector<16x32xf32>
    %c0_10 = arith.constant 0 : index
    %c0_11 = arith.constant 0 : index
    %10 = vector.load %arg5[%c0_10, %c0_11] : memref<32x32xf32, #tpu.memory_space<vmem>>, vector<32x32xf32>
    %cst_12 = arith.constant dense<0.000000e+00> : vector<16x32xf32>
    %11 = tpu.matmul %3, %10, %cst_12 {dimension_numbers = #tpu.dot_dimension_numbers<[1], [0], [0], [1], [0, 0, 1, 1], [], []>} : vector<16x32xf32>, vector<32x32xf32>, vector<16x32xf32> -> vector<16x32xf32>
    %12 = arith.addf %9, %11 : vector<16x32xf32>
    %c0_13 = arith.constant 0 : index
    %c0_14 = arith.constant 0 : index
    %13 = vector.load %arg11[%c0_13, %c0_14] : memref<16x32xf32, #tpu.memory_space<vmem>>, vector<16x32xf32>
    tpu.vector_store %arg11[%c0_13, %c0_14], %12 {strides = array<i32>} : memref<16x32xf32, #tpu.memory_space<vmem>>, vector<16x32xf32>,
    %c0_15 = arith.constant 0 : index
    %c0_16 = arith.constant 0 : index
    %14 = vector.load %arg12[%c0_15, %c0_16] : memref<16x32xf32, #tpu.memory_space<vmem>>, vector<16x32xf32>
    %c0_17 = arith.constant 0 : index
    %c0_18 = arith.constant 0 : index
    %15 = vector.load %arg6[%c0_17, %c0_18] : memref<32x32xf32, #tpu.memory_space<vmem>>, vector<32x32xf32>
    %cst_19 = arith.constant dense<0.000000e+00> : vector<16x32xf32>
    %16 = tpu.matmul %3, %15, %cst_19 {dimension_numbers = #tpu.dot_dimension_numbers<[1], [0], [0], [1], [0, 0, 1, 1], [], []>} : vector<16x32xf32>, vector<32x32xf32>, vector<16x32xf32> -> vector<16x32xf32>
    %17 = arith.addf %14, %16 : vector<16x32xf32>
    %c0_20 = arith.constant 0 : index
    %c0_21 = arith.constant 0 : index
    %18 = vector.load %arg12[%c0_20, %c0_21] : memref<16x32xf32, #tpu.memory_space<vmem>>, vector<16x32xf32>
    tpu.vector_store %arg12[%c0_20, %c0_21], %17 {strides = array<i32>} : memref<16x32xf32, #tpu.memory_space<vmem>>, vector<16x32xf32>,
    %c0_i32_22 = arith.constant 0 : i32
    %19 = arith.cmpi eq, %arg2, %c0_i32_22 : i32
    %20 = arith.extui %19 : i1 to i32
    %c0_i32_23 = arith.constant 0 : i32
    %21 = arith.cmpi ne, %20, %c0_i32_23 : i32
    scf.if %21 {
      %c0_24 = arith.constant 0 : index
      %c0_25 = arith.constant 0 : index
      %22 = vector.load %arg10[%c0_24, %c0_25] : memref<16x32xf32, #tpu.memory_space<vmem>>, vector<16x32xf32>
      %cst_26 = arith.constant 5.000000e-01 : f32
      %23 = vector.broadcast %cst_26 : f32 to vector<16x32xf32>
      %24 = arith.mulf %22, %23 : vector<16x32xf32>
      %c0_27 = arith.constant 0 : index
      %c0_28 = arith.constant 0 : index
      %25 = vector.load %arg7[%c0_27, %c0_28] : memref<16x32xf32, #tpu.memory_space<vmem>>, vector<16x32xf32>
      tpu.vector_store %arg7[%c0_27, %c0_28], %24 {strides = array<i32>} : memref<16x32xf32, #tpu.memory_space<vmem>>, vector<16x32xf32>,
      %c0_29 = arith.constant 0 : index
      %c0_30 = arith.constant 0 : index
      %26 = vector.load %arg11[%c0_29, %c0_30] : memref<16x32xf32, #tpu.memory_space<vmem>>, vector<16x32xf32>
      %c0_31 = arith.constant 0 : index
      %c0_32 = arith.constant 0 : index
      %27 = vector.load %arg8[%c0_31, %c0_32] : memref<16x32xf32, #tpu.memory_space<vmem>>, vector<16x32xf32>
      tpu.vector_store %arg8[%c0_31, %c0_32], %26 {strides = array<i32>} : memref<16x32xf32, #tpu.memory_space<vmem>>, vector<16x32xf32>,
      %c0_33 = arith.constant 0 : index
      %c0_34 = arith.constant 0 : index
      %28 = vector.load %arg12[%c0_33, %c0_34] : memref<16x32xf32, #tpu.memory_space<vmem>>, vector<16x32xf32>
      %c0_35 = arith.constant 0 : index
      %c0_36 = arith.constant 0 : index
      %29 = vector.load %arg9[%c0_35, %c0_36] : memref<16x32xf32, #tpu.memory_space<vmem>>, vector<16x32xf32>
      tpu.vector_store %arg9[%c0_35, %c0_36], %28 {strides = array<i32>} : memref<16x32xf32, #tpu.memory_space<vmem>>, vector<16x32xf32>,
    } else {
    }
    return
  }
  func.func @transform_0(%arg0: i32, %arg1: i32, %arg2: i32) -> (i32, i32) {
    %c0_i32 = arith.constant 0 : i32
    return %arg0, %arg2 : i32, i32
  }
  func.func @transform_1(%arg0: i32, %arg1: i32, %arg2: i32) -> (i32, i32) {
    %c0_i32 = arith.constant 0 : i32
    return %arg2, %arg1 : i32, i32
  }
  func.func @transform_2(%arg0: i32, %arg1: i32, %arg2: i32) -> (i32, i32) {
    %c0_i32 = arith.constant 0 : i32
    return %arg2, %arg1 : i32, i32
  }
  func.func @transform_3(%arg0: i32, %arg1: i32, %arg2: i32) -> (i32, i32) {
    %c0_i32 = arith.constant 0 : i32
    return %arg2, %arg1 : i32, i32
  }
  func.func @transform_4(%arg0: i32, %arg1: i32, %arg2: i32) -> (i32, i32) {
    %c0_i32 = arith.constant 0 : i32
    return %arg0, %arg1 : i32, i32
  }
  func.func @transform_5(%arg0: i32, %arg1: i32, %arg2: i32) -> (i32, i32) {
    %c0_i32 = arith.constant 0 : i32
    return %arg0, %arg1 : i32, i32
  }
  func.func @transform_6(%arg0: i32, %arg1: i32, %arg2: i32) -> (i32, i32) {
    %c0_i32 = arith.constant 0 : i32
    return %arg0, %arg1 : i32, i32
  }
}

</mosaic_0001>

<bundles_post_ra>
// kernel: tpu_custom_call.1
= control target key start
LH: loop header
LB: loop body
LE: loop exit
PB: predicated region body
PF: predicated region fallthrough
CT: control target
= control target key end

     0   :  { %12 = vsyncpa [#allocation6], 0  ;;  %s872_s0 = inlined_call_operand.hbm [shape: f32[16,32], index: 0, kind: input, shape index: {}]   ;;  %s873_s1 = inlined_call_operand.hbm [shape: f32[32,32], index: 1, kind: input, shape index: {}]   ;;  %s874_s2 = inlined_call_operand.hbm [shape: f32[32,32], index: 2, kind: input, shape index: {}]   ;;  %s875_s3 = inlined_call_operand.hbm [shape: f32[32,32], index: 3, kind: input, shape index: {}]   ;;  %s876_s4 = inlined_call_operand.hbm [shape: f32[16,32], index: 4, kind: output, shape index: {0}]   ;;  %s877_s5 = inlined_call_operand.hbm [shape: f32[16,32], index: 5, kind: output, shape index: {1}]   ;;  %s878_s6 = inlined_call_operand.hbm [shape: f32[16,32], index: 6, kind: output, shape index: {2}]  }
   0x1   :  { %13 = vsyncpa [#allocation9], 0 }
   0x2   :  { %14 = vsyncpa [#allocation12], 0 }
   0x3   :  { %15 = vsyncpa [#allocation7], 0 }
   0x4   :  { %16 = vsyncpa [#allocation15], 0  ;;  %s674_s21 = smov [#allocation8]   ;;  %s675_s23 = smov [#allocation5]  }
   0x5   :  { %s34_s22 = sshll.u32 %s674_s21, 4  ;;  %s22_s24 = sshll.u32 %s675_s23, 4  ;;  %s35_s22 = int_to_ptr.vmem [resolvable:$true] %s34_s22  ;;  %s719_s24 = int_to_ptr.vmem [resolvable:$true] %s22_s24 }
   0x6   :  { %s510_s27 = scalar_lea.hbm %s873_s1, 512 }
   0x7   :  { %p511_p0 = scmp.ne.s32.totalorder %s873_s1, %s510_s27  ;;  %p514_p1 = scmp.lt.u32.totalorder %s510_s27, %s873_s1 }
   0x9   :  { %p516_p2 = pnand %p514_p1, %p511_p0 }
   0xb   :  { %519 = shalt.err (!%p516_p2)
}
   0xc   :  { %s520_s8 = scalar_lea.vmem %s35_s22, 512  ;;  %p525_p4 = scmp.lt.s32.totalorder %s35_s22, %s35_s22 }
   0xd   :  { %p521_p3 = scmp.ne.s32.totalorder %s35_s22, %s520_s8  ;;  %p526_p5 = scmp.lt.s32.totalorder %s520_s8, %s520_s8 }
   0xf   :  { %p527_p6 = por %p526_p5, %p525_p4 }
  0x11   :  { %p528_p7 = pnand %p527_p6, %p521_p3 }
  0x13   :  { %531 = shalt.err (!%p528_p7)
}
  0x14   :  { %s676_s9 = smov 128   ;;  %s677_s10 = smov 8  }
  0x15   :  { %40 = dma.hbm_to_vmem [thread:$0]  %s873_s1, 512, %s35_s22, [#allocation9], %s676_s9, %s676_s9, %s677_s10  }
  0x16   :  { %s532_s15 = scalar_lea.hbm %s872_s0, 256 }
  0x17   :  { %p533_p8 = scmp.ne.s32.totalorder %s872_s0, %s532_s15  ;;  %p536_p9 = scmp.lt.u32.totalorder %s532_s15, %s872_s0 }
  0x19   :  { %p538_p10 = pnand %p536_p9, %p533_p8 }
  0x1b   :  { %541 = shalt.err (!%p538_p10)
}
  0x1c   :  { %s542_s20 = scalar_lea.vmem %s719_s24, 256  ;;  %p547_p12 = scmp.lt.s32.totalorder %s719_s24, %s719_s24 }
  0x1d   :  { %p543_p11 = scmp.ne.s32.totalorder %s719_s24, %s542_s20  ;;  %p548_p13 = scmp.lt.s32.totalorder %s542_s20, %s542_s20 }
  0x1f   :  { %p549_p0 = por %p548_p13, %p547_p12 }
  0x21   :  { %p550_p1 = pnand %p549_p0, %p543_p11 }
  0x23   :  { %553 = shalt.err (!%p550_p1)
}
  0x24   :  { %28 = dma.hbm_to_vmem [thread:$0]  %s872_s0, 256, %s719_s24, [#allocation6], %s676_s9, %s676_s9, %s677_s10  }
  0x25   :  { %s678_s22 = smov [#allocation10]   ;;  %s679_s25 = smov [#allocation11]  }
  0x26   :  { %s46_s23 = sshll.u32 %s678_s22, 4  ;;  %s58_s26 = sshll.u32 %s679_s25, 4  ;;  %s47_s23 = int_to_ptr.vmem [resolvable:$true] %s46_s23  ;;  %s756_s26 = int_to_ptr.vmem [resolvable:$true] %s58_s26 }
  0x27   :  { %s554_s29 = scalar_lea.hbm %s874_s2, 512 }
  0x28   :  { %p555_p2 = scmp.ne.s32.totalorder %s874_s2, %s554_s29  ;;  %p558_p3 = scmp.lt.u32.totalorder %s554_s29, %s874_s2 }
  0x2a   :  { %p560_p4 = pnand %p558_p3, %p555_p2 }
  0x2c   :  { %563 = shalt.err (!%p560_p4)
}
  0x2d   :  { %s564_s0 = scalar_lea.vmem %s47_s23, 512  ;;  %p569_p6 = scmp.lt.s32.totalorder %s47_s23, %s47_s23 }
  0x2e   :  { %p565_p5 = scmp.ne.s32.totalorder %s47_s23, %s564_s0  ;;  %p570_p7 = scmp.lt.s32.totalorder %s564_s0, %s564_s0 }
  0x30   :  { %p571_p8 = por %p570_p7, %p569_p6 }
  0x32   :  { %p572_p9 = pnand %p571_p8, %p565_p5 }
  0x34   :  { %575 = shalt.err (!%p572_p9)
}
  0x35   :  { %52 = dma.hbm_to_vmem [thread:$0]  %s874_s2, 512, %s47_s23, [#allocation9], %s676_s9, %s676_s9, %s677_s10  }
  0x36   :  { %s576_s15 = scalar_lea.hbm %s875_s3, 512 }
  0x37   :  { %p577_p10 = scmp.ne.s32.totalorder %s875_s3, %s576_s15  ;;  %p580_p11 = scmp.lt.u32.totalorder %s576_s15, %s875_s3 }
  0x39   :  { %p582_p12 = pnand %p580_p11, %p577_p10 }
  0x3b   :  { %585 = shalt.err (!%p582_p12)
}
  0x3c   :  { %s586_s20 = scalar_lea.vmem %s756_s26, 512  ;;  %p591_p0 = scmp.lt.s32.totalorder %s756_s26, %s756_s26 }
  0x3d   :  { %p587_p13 = scmp.ne.s32.totalorder %s756_s26, %s586_s20  ;;  %p592_p1 = scmp.lt.s32.totalorder %s586_s20, %s586_s20 }
  0x3f   :  { %p593_p2 = por %p592_p1, %p591_p0 }
  0x41   :  { %p594_p3 = pnand %p593_p2, %p587_p13 }
  0x43   :  { %597 = shalt.err (!%p594_p3)
}
  0x44   :  { %64 = dma.hbm_to_vmem [thread:$0]  %s875_s3, 512, %s756_s26, [#allocation12], %s676_s9, %s676_s9, %s677_s10  }
  0x45   :  { %664 = dma.done.wait [#allocation6], 256  }
  0x46   :  { %665 = vsyncadd [#allocation6], 4294967040 }
  0x47   :  { %666 = dma.done.wait [#allocation9], 1024  }
  0x48   :  { %667 = vsyncadd [#allocation9], 4294966272 }
  0x49   :  { %668 = dma.done.wait [#allocation12], 512  }
  0x4a   :  { %669 = vsyncadd [#allocation12], 4294966784  ;;  %vm81_vm0 = vcmask 261120   ;;  %v680_v0 = vmov 0.0   ;;  %v92_v1 = vld [vmem:[#allocation8] sm:$0xff]  ;;  %v93_v2 = vld [vmem:[#allocation8 + $0x8] sm:$0xff] }
  0x4b   :  { %83 = vst.msk [vmem:[#allocation2 + $0x8] sm:$0xff] %vm81_vm0, %v680_v0  ;;  %82 = vst.msk [vmem:[#allocation2] sm:$0xff] %vm81_vm0, %v680_v0  ;;  %v94_v3 = vld [vmem:[#allocation8 + $0x10] sm:$0xff]  ;;  %v476_v4 = vpack.c.bf16 %v93_v2, %v92_v1  ;;  %v95_v5 = vld [vmem:[#allocation8 + $0x18] sm:$0xff]  ;;  %s681_s3 = smov [#allocation14]   ;;  %s682_s22 = smov [#allocation13]  }
  0x4c   :  { %84 = vst.msk [vmem:[#allocation3] sm:$0xff] %vm81_vm0, %v680_v0  ;;  %85 = vst.msk [vmem:[#allocation3 + $0x8] sm:$0xff] %vm81_vm0, %v680_v0  ;;  %v184_v6 = vld [vmem:[#allocation10] sm:$0xff]  ;;  %v185_v7 = vld [vmem:[#allocation10 + $0x8] sm:$0xff]  ;;  %v480_v8 = vpack.c.bf16 %v95_v5, %v94_v3  ;;  %s386_s21 = sshll.u32 %s681_s3, 4  ;;  %s374_s23 = sshll.u32 %s682_s22, 4  ;;  %s387_s21 = int_to_ptr.vmem [resolvable:$true] %s386_s21  ;;  %s812_s23 = int_to_ptr.vmem [resolvable:$true] %s374_s23 }
  0x4d   :  { %86 = vst.msk [vmem:[#allocation4] sm:$0xff] %vm81_vm0, %v680_v0  ;;  %87 = vst.msk [vmem:[#allocation4 + $0x8] sm:$0xff] %vm81_vm0, %v680_v0  ;;  %v484_v9 = vpack.c.bf16 %v185_v7, %v184_v6  ;;  %v88_v10 = vld [vmem:[#allocation5] sm:$0xff]  ;;  %v269_v11 = vld [vmem:[#allocation11] sm:$0xff]  ;;  %477 = vmatprep.subr.bf16.mxu0 %v476_v4  ;;  %s683_s25 = smov [#allocation16]   ;;  %s598_s27 = scalar_lea.vmem %s387_s21, 256 }
  0x4e   :  { %451 = vmatprep.mubr.msk.f32.mxu0 %vm81_vm0, %v88_v10  ;;  %v270_v12 = vld [vmem:[#allocation11 + $0x8] sm:$0xff]  ;;  %v186_v13 = vld [vmem:[#allocation10 + $0x10] sm:$0xff]  ;;  %v187_v14 = vld [vmem:[#allocation10 + $0x18] sm:$0xff]  ;;  %479 = vmatpush3.bf16.msra.mxu0 %v476_v4  ;;  %s816_s26 = sshll.u32 %s683_s25, 4  ;;  %p599_p4 = scmp.ne.s32.totalorder %s387_s21, %s598_s27  ;;  %s399_s26 = int_to_ptr.vmem [resolvable:$true] %s816_s26 }
  0x4f   :  { %485 = vmatprep.subr.bf16.mxu1 %v484_v9  ;;  %v488_v15 = vpack.c.bf16 %v187_v14, %v186_v13  ;;  %481 = vmatprep.subr.bf16.mxu0 %v480_v8  ;;  %v492_v16 = vpack.c.bf16 %v270_v12, %v269_v11  ;;  %v271_v17 = vld [vmem:[#allocation11 + $0x10] sm:$0xff]  ;;  %v272_v18 = vld [vmem:[#allocation11 + $0x18] sm:$0xff]  ;;  %p603_p5 = scmp.lt.s32.totalorder %s387_s21, %s387_s21  ;;  %p604_p6 = scmp.lt.s32.totalorder %s598_s27, %s598_s27 }
  0x50   :  { %487 = vmatpush3.bf16.msra.mxu1 %v484_v9  ;;  %462 = vmatprep.mubr.msk.f32.mxu1 %vm81_vm0, %v88_v10  ;;  %v89_v19 = vld [vmem:[#allocation5 + $0x8] sm:$0xff]  ;;  %v496_v20 = vpack.c.bf16 %v272_v18, %v271_v17 }
  0x51   :  { %489 = vmatprep.subr.bf16.mxu1 %v488_v15  ;;  %p605_p7 = por %p604_p6, %p603_p5 }
  0x52   :  { %483 = vmatpush3.bf16.msra.mxu0 %v480_v8  ;;  %v91_v21 = vld [vmem:[#allocation2 + $0x8] sm:$0xff]  ;;  %v90_v22 = vld [vmem:[#allocation2] sm:$0xff] }
  0x53   :  { %493 = vmatprep.subr.bf16.mxu0 %v492_v16  ;;  %v183_v23 = vld [vmem:[#allocation3 + $0x8] sm:$0xff]  ;;  %v182_v25 = vld [vmem:[#allocation3] sm:$0xff]  ;;  %p606_p8 = pnand %p605_p7, %p599_p4 }
  0x54   :  { %491 = vmatpush3.bf16.msra.mxu1 %v488_v15  ;;  %v268_v33 = vld [vmem:[#allocation4 + $0x8] sm:$0xff]  ;;  %v267_v34 = vld [vmem:[#allocation4] sm:$0xff] }
  0x55   :  { %452 = vmatmul.mubr.msk.f32.vlgmr.msra.gmra.mrb[0].mxu0 %vm81_vm0, %v89_v19 }
  0x56   :  { %495 = vmatpush3.bf16.msra.mxu0 %v492_v16  ;;  %473 = vmatprep.mubr.msk.f32.mxu0 %vm81_vm0, %v88_v10 }
  0x57   :  { %463 = vmatmul.mubr.msk.f32.vlgmr.msra.gmra.mrb[0].mxu1 %vm81_vm0, %v89_v19  ;;  %497 = vmatprep.subr.bf16.mxu0 %v496_v20 }
  0x5a   :  { %499 = vmatpush3.bf16.msra.mxu0 %v496_v20 }
  0x5d   :  { %474 = vmatmul.mubr.msk.f32.vlgmr.msra.gmra.mrb[2].mxu0 %vm81_vm0, %v89_v19 }
 0x128   :  { %v453_v24 = vpop.f32.mrb[0].mxu0 }
 0x129   :  { %v179_v26 = vadd.f32 %v453_v24, %v91_v21  ;;  %v169_v27 = vpop.f32.mrb[1].mxu0 }
 0x12a   :  { %v464_v28 = vpop.f32.mrb[0].mxu1  ;;  %v178_v29 = vadd.f32 %v169_v27, %v90_v22 }
 0x12b   :  { %v264_v30 = vadd.f32 %v464_v28, %v183_v23  ;;  %v254_v31 = vpop.f32.mrb[1].mxu1  ;;  %181 = vst.msk [vmem:[#allocation2 + $0x8] sm:$0xff] %vm81_vm0, %v179_v26 }
 0x12c   :  { %v263_v32 = vadd.f32 %v254_v31, %v182_v25  ;;  %180 = vst.msk [vmem:[#allocation2] sm:$0xff] %vm81_vm0, %v178_v29 }
 0x12d   :  { %266 = vst.msk [vmem:[#allocation3 + $0x8] sm:$0xff] %vm81_vm0, %v264_v30 }
 0x12e   :  { %265 = vst.msk [vmem:[#allocation3] sm:$0xff] %vm81_vm0, %v263_v32 }
 0x130   :  { %v475_v35 = vpop.f32.mrb[2].mxu0 }
 0x131   :  { %v349_v36 = vadd.f32 %v475_v35, %v268_v33  ;;  %v339_v37 = vpop.f32.mrb[3].mxu0 }
 0x132   :  { %v348_v38 = vadd.f32 %v339_v37, %v267_v34  ;;  %v356_v39 = vld [vmem:[#allocation2 + $0x8] sm:$0xff] }
 0x133   :  { %351 = vst.msk [vmem:[#allocation4 + $0x8] sm:$0xff] %vm81_vm0, %v349_v36  ;;  %v355_v41 = vld [vmem:[#allocation2] sm:$0xff]  ;;  %v358_v42 = vmul.f32 0.5, %v356_v39 }
 0x134   :  { %v362_v40 = vld [vmem:[#allocation3 + $0x8] sm:$0xff]  ;;  %350 = vst.msk [vmem:[#allocation4] sm:$0xff] %vm81_vm0, %v348_v38  ;;  %v357_v44 = vmul.f32 0.5, %v355_v41 }
 0x135   :  { %v361_v43 = vld [vmem:[#allocation3] sm:$0xff]  ;;  %364 = vst.msk [vmem:[#allocation14 + $0x8] sm:$0xff] %vm81_vm0, %v362_v40  ;;  %360 = vst.msk [vmem:[#allocation13 + $0x8] sm:$0xff] %vm81_vm0, %v358_v42 }
 0x136   :  { %363 = vst.msk [vmem:[#allocation14] sm:$0xff] %vm81_vm0, %v361_v43 }
 0x137   :  { %609 = shalt.err (!%p606_p8)
}
 0x138   :  { %s610_s30 = scalar_lea.hbm %s877_s5, 256 }
 0x139   :  { %p611_p9 = scmp.ne.s32.totalorder %s877_s5, %s610_s30  ;;  %p614_p10 = scmp.lt.u32.totalorder %s610_s30, %s877_s5 }
 0x13b   :  { %p616_p11 = pnand %p614_p10, %p611_p9 }
 0x13d   :  { %619 = shalt.err (!%p616_p11)
}
 0x13e   :  { %392 = dma.vmem_to_hbm [thread:$0]  %s387_s21, 256, %s877_s5, [#allocation15], %s676_s9, %s676_s9, %s677_s10   ;;  %359 = vst.msk [vmem:[#allocation13] sm:$0xff] %vm81_vm0, %v357_v44 }
 0x13f   :  { %s620_s13 = scalar_lea.vmem %s812_s23, 256  ;;  %p625_p13 = scmp.lt.s32.totalorder %s812_s23, %s812_s23 }
 0x140   :  { %p621_p12 = scmp.ne.s32.totalorder %s812_s23, %s620_s13  ;;  %p626_p0 = scmp.lt.s32.totalorder %s620_s13, %s620_s13 }
 0x142   :  { %p627_p1 = por %p626_p0, %p625_p13 }
 0x144   :  { %p628_p2 = pnand %p627_p1, %p621_p12 }
 0x146   :  { %631 = shalt.err (!%p628_p2)
}
 0x147   :  { %s632_s16 = scalar_lea.hbm %s876_s4, 256 }
 0x148   :  { %p633_p3 = scmp.ne.s32.totalorder %s876_s4, %s632_s16  ;;  %p636_p4 = scmp.lt.u32.totalorder %s632_s16, %s876_s4 }
 0x14a   :  { %p638_p5 = pnand %p636_p4, %p633_p3 }
 0x14c   :  { %641 = shalt.err (!%p638_p5)
}
 0x14d   :  { %380 = dma.vmem_to_hbm [thread:$0]  %s812_s23, 256, %s876_s4, [#allocation7], %s676_s9, %s676_s9, %s677_s10   ;;  %v366_v45 = vld [vmem:[#allocation4 + $0x8] sm:$0xff]  ;;  %v365_v46 = vld [vmem:[#allocation4] sm:$0xff] }
 0x14e   :  { %368 = vst.msk [vmem:[#allocation16 + $0x8] sm:$0xff] %vm81_vm0, %v366_v45  ;;  %367 = vst.msk [vmem:[#allocation16] sm:$0xff] %vm81_vm0, %v365_v46  ;;  %s642_s1 = scalar_lea.vmem %s399_s26, 256  ;;  %p647_p7 = scmp.lt.s32.totalorder %s399_s26, %s399_s26 }
 0x14f   :  { %p643_p6 = scmp.ne.s32.totalorder %s399_s26, %s642_s1  ;;  %p648_p8 = scmp.lt.s32.totalorder %s642_s1, %s642_s1 }
 0x151   :  { %p649_p9 = por %p648_p8, %p647_p7 }
 0x153   :  { %p650_p10 = pnand %p649_p9, %p643_p6 }
 0x155   :  { %653 = shalt.err (!%p650_p10)
}
 0x156   :  { %s654_s22 = scalar_lea.hbm %s878_s6, 256 }
 0x157   :  { %p655_p11 = scmp.ne.s32.totalorder %s878_s6, %s654_s22  ;;  %p658_p12 = scmp.lt.u32.totalorder %s654_s22, %s878_s6 }
 0x159   :  { %p660_p13 = pnand %p658_p12, %p655_p11 }
 0x15b   :  { %663 = shalt.err (!%p660_p13)
}
 0x15c   :  { %404 = dma.vmem_to_hbm [thread:$0]  %s399_s26, 256, %s878_s6, [#allocation15], %s676_s9, %s676_s9, %s677_s10  }
 0x15d   :  { %670 = dma.done.wait [#allocation7], 256  }
 0x15e   :  { %671 = vsyncadd [#allocation7], 4294967040 }
 0x15f   :  { %672 = dma.done.wait [#allocation15], 512  }
 0x160   :  { %673 = vsyncadd [#allocation15], 4294966784 }
 0x161   :  { %414 = vsyncpa [#allocation6], 1 }
 0x162   :  { %415 = vsyncpa [#allocation9], 1 }
 0x163   :  { %416 = vsyncpa [#allocation12], 1 }
 0x164   :  { %417 = vsyncpa [#allocation7], 1 }
 0x165   :  { %418 = vsyncpa [#allocation15], 1 }

</bundles_post_ra>
